<compile_context>
chip_gen: v7x
topology: tpu7x:2x2x1
jax: 0.10.0
libtpu: 0.0.40
codegen_flags: <defaults>
</compile_context>

<pallas_src>
import math

import jax
import jax.numpy as jnp
from jax.experimental import pallas as pl
from jax.experimental.pallas import tpu as pltpu


_SMALL_BYTES = 512 * 1024  # below this, a single full-array block is fine


def _minus_kernel(x_ref, y_ref, o_ref):
    # Elementwise subtract on the whole VMEM tile.  Dtype casts ride the VPU
    # for free; jnp broadcasting handles size-1 / lower-rank operands so no
    # broadcast is ever materialized in HBM.
    o_ref[...] = x_ref[...].astype(o_ref.dtype) - y_ref[...].astype(o_ref.dtype)


def _round_up(v: int, m: int) -> int:
    return ((v + m - 1) // m) * m


def _chip_budget():
    """(per-operand tile target bytes, scoped-VMEM limit bytes) for this chip."""
    try:
        cap = pltpu.get_tpu_info().vmem_capacity_bytes
    except Exception:
        cap = None
    if cap is None:
        # Safe everywhere: 3 operands x 2 pipeline buffers x 4 MiB = 24 MiB.
        return 4 * 1024 * 1024, 40 * 1024 * 1024
    if cap <= 80 * 1024 * 1024:
        # v7x: 64 MiB physical VMEM per TensorCore -> 3 x 2 x 5 MiB = 30 MiB.
        return 5 * 1024 * 1024, 44 * 1024 * 1024
    # v5e / v6e: 128 MiB VMEM -> larger tiles are free.
    return 6 * 1024 * 1024, 64 * 1024 * 1024


def minus(x: jax.Array, y: jax.Array) -> jax.Array:
    """Pallas TPU equivalent of torch's `x - y` (with broadcasting)."""
    x = jnp.asarray(x)
    y = jnp.asarray(y)
    # TODO(synk): jnp.result_type may differ from torch promotion in exotic
    # mixed-integer corner cases (e.g. uint8 with int8).
    out_dtype = jnp.result_type(x.dtype, y.dtype)
    out_shape = jnp.broadcast_shapes(x.shape, y.shape)
    total = math.prod(out_shape)

    if total == 0:
        return jnp.zeros(out_shape, out_dtype)

    max_item = max(
        jnp.dtype(x.dtype).itemsize,
        jnp.dtype(y.dtype).itemsize,
        jnp.dtype(out_dtype).itemsize,
    )

    # ---- degenerate: scalar output (both operands scalar-like) ----
    if len(out_shape) == 0:
        out = pl.pallas_call(
            _minus_kernel,
            out_shape=jax.ShapeDtypeStruct((1, 1), out_dtype),
        )(x.reshape(1, 1), y.reshape(1, 1))
        return out.reshape(())

    # ---- small: one full-array block, broadcasting inside the kernel ----
    if total * max_item <= _SMALL_BYTES:
        xb = x if x.ndim else x.reshape(1)
        yb = y if y.ndim else y.reshape(1)
        return pl.pallas_call(
            _minus_kernel,
            out_shape=jax.ShapeDtypeStruct(out_shape, out_dtype),
        )(xb, yb)

    # ---- large: tiled, HBM-bandwidth-bound path ----
    target_bytes, vmem_limit = _chip_budget()

    def prep(a, want_2d):
        """Flatten (free) or keep as a size-1 'scalar' block; returns (arr, is_scalar)."""
        if a.size == total:
            return a.reshape(-1), False
        if a.size == 1:
            return (a.reshape(1, 1) if want_2d else a.reshape(1)), True
        # TODO(synk): a general broadcast-aware BlockSpec (reusing the small
        # operand across grid steps) would avoid this HBM materialization.
        return jnp.broadcast_to(a, out_shape).reshape(-1), False

    lane = next((c for c in (2048, 1024, 512, 256, 128) if total % c == 0), None)

    if lane is not None:
        rows = total // lane
        x_arg, x_sc = prep(x, True)
        y_arg, y_sc = prep(y, True)
        if not x_sc:
            x_arg = x_arg.reshape(rows, lane)
        if not y_sc:
            y_arg = y_arg.reshape(rows, lane)

        # ~target_bytes per operand tile; tile_rows multiple of 32 keeps the
        # sublane tiling unmasked for f32 (8), bf16 (16) and int8 (32) alike.
        tile_rows = max(32, (target_bytes // (lane * max_item)) // 32 * 32)
        num_steps = pl.cdiv(rows, tile_rows)
        if num_steps == 1:
            if rows >= 64:
                # Ensure >= 2 grid steps so v7x's two TensorCores both get work.
                tile_rows = _round_up(-(-rows // 2), 32)
            else:
                tile_rows = rows
        elif num_steps % 2 == 1 and num_steps <= 16:
            # Nudge to an even step count (v7x megacore balance); best effort.
            nudged = _round_up(-(-rows // (num_steps + 1)), 32)
            if 32 <= nudged < tile_rows:
                tile_rows = nudged
        num_steps = pl.cdiv(rows, tile_rows)

        def spec(is_scalar):
            if is_scalar:
                # Size-1 operand: constant block index -> DMA'd once, reused.
                return pl.BlockSpec((1, 1), lambda i: (0, 0))
            return pl.BlockSpec((tile_rows, lane), lambda i: (i, 0))

        out2 = pl.pallas_call(
            _minus_kernel,
            out_shape=jax.ShapeDtypeStruct((rows, lane), out_dtype),
            grid=(num_steps,),
            in_specs=[spec(x_sc), spec(y_sc)],
            out_specs=pl.BlockSpec((tile_rows, lane), lambda i: (i, 0)),
            compiler_params=pltpu.CompilerParams(
                dimension_semantics=("parallel",),  # shards steps over v7x's 2 TCs
                vmem_limit_bytes=vmem_limit,
            ),
        )(x_arg, y_arg)
        return out2.reshape(out_shape)

    # Large but total % 128 != 0: 1-D blocks; Pallas masks the partial last
    # block, so there are no jnp.pad / output-slice HBM passes.  Block kept at
    # a conservative 512 KiB since 1-D VMEM layouts can be less dense.
    x_arg, x_sc = prep(x, False)
    y_arg, y_sc = prep(y, False)
    block = max(1024, (min(target_bytes, 512 * 1024) // max_item) // 1024 * 1024)
    num_steps = pl.cdiv(total, block)

    def spec1(is_scalar):
        if is_scalar:
            return pl.BlockSpec((1,), lambda i: (0,))
        return pl.BlockSpec((block,), lambda i: (i,))

    out_flat = pl.pallas_call(
        _minus_kernel,
        out_shape=jax.ShapeDtypeStruct((total,), out_dtype),
        grid=(num_steps,),
        in_specs=[spec1(x_sc), spec1(y_sc)],
        out_specs=pl.BlockSpec((block,), lambda i: (i,)),
        compiler_params=pltpu.CompilerParams(
            dimension_semantics=("parallel",),
            vmem_limit_bytes=vmem_limit,
        ),
    )(x_arg, y_arg)
    return out_flat.reshape(out_shape)


if __name__ == "__main__":
    key = jax.random.PRNGKey(0)
    kx, ky = jax.random.split(key)

    # 1) NCHW small shape: batch=2, channels=4, spatial=16x16 (single-block path).
    x = jax.random.normal(kx, (2, 4, 16, 16), dtype=jnp.float32)
    y = jax.random.normal(ky, (2, 4, 16, 16), dtype=jnp.float32)
    out = minus(x, y)
    jax.block_until_ready(out)
    expected = x - y
    assert out.shape == expected.shape
    assert jnp.allclose(out, expected, atol=1e-6), "mismatch (small path)"

    # 2) Awkward small shape (total % 128 != 0) — no padding needed anymore.
    kx2, ky2 = jax.random.split(ky)
    x2 = jax.random.normal(kx2, (3, 5, 7), dtype=jnp.float32)
    y2 = jax.random.normal(ky2, (3, 5, 7), dtype=jnp.float32)
    out2 = minus(x2, y2)
    jax.block_until_ready(out2)
    expected2 = x2 - y2
    assert out2.shape == expected2.shape
    assert jnp.allclose(out2, expected2, atol=1e-6), "mismatch (awkward shape)"

    # 3) Scalar broadcast — handled inside the kernel, nothing materialized in HBM.
    y_scalar = jnp.float32(2.5)
    out3 = minus(x, y_scalar)
    jax.block_until_ready(out3)
    expected3 = x - y_scalar
    assert out3.shape == expected3.shape
    assert jnp.allclose(out3, expected3, atol=1e-6), "mismatch (scalar broadcast)"

    # 4) Mixed dtypes — cast happens inside the kernel.
    xb = x.astype(jnp.bfloat16)
    out4 = minus(xb, y)
    jax.block_until_ready(out4)
    expected4 = xb - y
    assert out4.dtype == expected4.dtype
    assert jnp.allclose(out4, expected4, atol=1e-6), "mismatch (mixed dtype)"

    # 5) Larger array to exercise the tiled 2-D path (2 MiB, grid of 2 steps).
    kx3, ky3 = jax.random.split(kx2)
    x5 = jax.random.normal(kx3, (8, 64, 32, 32), dtype=jnp.float32)
    y5 = jax.random.normal(ky3, (8, 64, 32, 32), dtype=jnp.float32)
    out5 = minus(x5, y5)
    jax.block_until_ready(out5)
    expected5 = x5 - y5
    assert out5.shape == expected5.shape
    assert jnp.allclose(out5, expected5, atol=1e-6), "mismatch (tiled path)"

    print("KERNEL_OK")
</pallas_src>

<mosaic_0001>
module attributes {stable_mosaic.version = 11 : i64} {
  func.func @_minus_kernel(%arg0: memref<2x4x16x16xf32, #tpu.memory_space<vmem>>, %arg1: memref<2x4x16x16xf32, #tpu.memory_space<vmem>>, %arg2: memref<2x4x16x16xf32, #tpu.memory_space<vmem>>) attributes {dimension_semantics = [], scalar_prefetch = 0 : i64, scratch_operands = 0 : i64, tpu.core_type = #tpu.core_type<tc>} {
    %c0 = arith.constant 0 : index
    %c0_0 = arith.constant 0 : index
    %c0_1 = arith.constant 0 : index
    %c0_2 = arith.constant 0 : index
    %0 = vector.load %arg0[%c0, %c0_0, %c0_1, %c0_2] : memref<2x4x16x16xf32, #tpu.memory_space<vmem>>, vector<2x4x16x16xf32>
    %c0_3 = arith.constant 0 : index
    %c0_4 = arith.constant 0 : index
    %c0_5 = arith.constant 0 : index
    %c0_6 = arith.constant 0 : index
    %1 = vector.load %arg1[%c0_3, %c0_4, %c0_5, %c0_6] : memref<2x4x16x16xf32, #tpu.memory_space<vmem>>, vector<2x4x16x16xf32>
    %2 = arith.subf %0, %1 : vector<2x4x16x16xf32>
    %c0_7 = arith.constant 0 : index
    %c0_8 = arith.constant 0 : index
    %c0_9 = arith.constant 0 : index
    %c0_10 = arith.constant 0 : index
    %3 = vector.load %arg2[%c0_7, %c0_8, %c0_9, %c0_10] : memref<2x4x16x16xf32, #tpu.memory_space<vmem>>, vector<2x4x16x16xf32>
    tpu.vector_store %arg2[%c0_7, %c0_8, %c0_9, %c0_10], %2 {strides = array<i32>} : memref<2x4x16x16xf32, #tpu.memory_space<vmem>>, vector<2x4x16x16xf32>,
    return
  }
}

</mosaic_0001>

<bundles_post_ra>
// kernel: tpu_custom_call.1
= control target key start
LH: loop header
LB: loop body
LE: loop exit
PB: predicated region body
PF: predicated region fallthrough
CT: control target
= control target key end

     0   :  { %7 = vsyncpa [#allocation3], 0  ;;  %s281_s0 = inlined_call_operand.hbm [shape: f32[2,4,16,16], index: 0, kind: input, shape index: {}]   ;;  %s282_s1 = inlined_call_operand.hbm [shape: f32[2,4,16,16], index: 1, kind: input, shape index: {}]   ;;  %s283_s2 = inlined_call_operand.hbm [shape: f32[2,4,16,16], index: 2, kind: output, shape index: {}]  }
   0x1   :  { %8 = vsyncpa [#allocation6], 0 }
   0x2   :  { %9 = vsyncpa [#allocation4], 0  ;;  %s200_s9 = smov [#allocation2]   ;;  %s128_s13 = scalar_lea.hbm %s281_s0, 2048 }
   0x3   :  { %s15_s10 = sshll.u32 %s200_s9, 4  ;;  %p129_p0 = scmp.ne.s32.totalorder %s281_s0, %s128_s13  ;;  %s16_s10 = int_to_ptr.vmem [resolvable:$true] %s15_s10 }
   0x4   :  { %p132_p1 = scmp.lt.u32.totalorder %s128_s13, %s281_s0 }
   0x6   :  { %p134_p2 = pnand %p132_p1, %p129_p0 }
   0x8   :  { %137 = shalt.err (!%p134_p2)
}
   0x9   :  { %s138_s18 = scalar_lea.vmem %s16_s10, 2048  ;;  %p143_p4 = scmp.lt.s32.totalorder %s16_s10, %s16_s10 }
   0xa   :  { %p139_p3 = scmp.ne.s32.totalorder %s16_s10, %s138_s18  ;;  %p144_p5 = scmp.lt.s32.totalorder %s138_s18, %s138_s18 }
   0xc   :  { %p145_p6 = por %p144_p5, %p143_p4 }
   0xe   :  { %p146_p7 = pnand %p145_p6, %p139_p3 }
  0x10   :  { %149 = shalt.err (!%p146_p7)
}
  0x11   :  { %s201_s19 = smov 128   ;;  %s202_s20 = smov 8  }
  0x12   :  { %21 = dma.hbm_to_vmem [thread:$0]  %s281_s0, 2048, %s16_s10, [#allocation3], %s201_s19, %s201_s19, %s202_s20  }
  0x13   :  { %s203_s23 = smov [#allocation5]   ;;  %s150_s27 = scalar_lea.hbm %s282_s1, 2048 }
  0x14   :  { %s27_s24 = sshll.u32 %s203_s23, 4  ;;  %p151_p8 = scmp.ne.s32.totalorder %s282_s1, %s150_s27  ;;  %s28_s24 = int_to_ptr.vmem [resolvable:$true] %s27_s24 }
  0x15   :  { %p154_p9 = scmp.lt.u32.totalorder %s150_s27, %s282_s1 }
  0x17   :  { %p156_p10 = pnand %p154_p9, %p151_p8 }
  0x19   :  { %159 = shalt.err (!%p156_p10)
}
  0x1a   :  { %s160_s4 = scalar_lea.vmem %s28_s24, 2048  ;;  %p165_p12 = scmp.lt.s32.totalorder %s28_s24, %s28_s24 }
  0x1b   :  { %p161_p11 = scmp.ne.s32.totalorder %s28_s24, %s160_s4  ;;  %p166_p13 = scmp.lt.s32.totalorder %s160_s4, %s160_s4 }
  0x1d   :  { %p167_p0 = por %p166_p13, %p165_p12 }
  0x1f   :  { %p168_p1 = pnand %p167_p0, %p161_p11 }
  0x21   :  { %171 = shalt.err (!%p168_p1)
}
  0x22   :  { %33 = dma.hbm_to_vmem [thread:$0]  %s282_s1, 2048, %s28_s24, [#allocation6], %s201_s19, %s201_s19, %s202_s20  }
  0x23   :  { %194 = dma.done.wait [#allocation3], 2048  }
  0x24   :  { %195 = vsyncadd [#allocation3], 4294965248 }
  0x25   :  { %196 = dma.done.wait [#allocation6], 2048  }
  0x26   :  { %197 = vsyncadd [#allocation6], 4294965248  ;;  %v40_v0 = vld [vmem:[#allocation2] sm:$0xff]  ;;  %vm88_vm0 = vcmask 130048   ;;  %v41_v2 = vld [vmem:[#allocation2 + $0x8] sm:$0xff]  ;;  %s204_s1 = smov [#allocation7]  }
  0x27   :  { %v56_v1 = vld [vmem:[#allocation5] sm:$0xff]  ;;  %v57_v4 = vld [vmem:[#allocation5 + $0x8] sm:$0xff]  ;;  %v42_v5 = vld [vmem:[#allocation2 + $0x10] sm:$0xff]  ;;  %s110_s6 = sshll.u32 %s204_s1, 4  ;;  %s111_s6 = int_to_ptr.vmem [resolvable:$true] %s110_s6 }
  0x28   :  { %v72_v3 = vsub.f32 %v40_v0, %v56_v1  ;;  %v58_v6 = vld [vmem:[#allocation5 + $0x10] sm:$0xff]  ;;  %v73_v7 = vsub.f32 %v41_v2, %v57_v4  ;;  %v43_v9 = vld [vmem:[#allocation2 + $0x18] sm:$0xff]  ;;  %v44_v11 = vld [vmem:[#allocation2 + $0x20] sm:$0xff]  ;;  %s172_s7 = scalar_lea.vmem %s111_s6, 2048  ;;  %p177_p3 = scmp.lt.s32.totalorder %s111_s6, %s111_s6 }
  0x29   :  { %v74_v8 = vsub.f32 %v42_v5, %v58_v6  ;;  %v59_v10 = vld [vmem:[#allocation5 + $0x18] sm:$0xff]  ;;  %v60_v13 = vld [vmem:[#allocation5 + $0x20] sm:$0xff]  ;;  %v45_v14 = vld [vmem:[#allocation2 + $0x28] sm:$0xff]  ;;  %p173_p2 = scmp.ne.s32.totalorder %s111_s6, %s172_s7  ;;  %p178_p4 = scmp.lt.s32.totalorder %s172_s7, %s172_s7 }
  0x2a   :  { %89 = vst.msk [vmem:[#allocation7] sm:$0xff] %vm88_vm0, %v72_v3  ;;  %v75_v12 = vsub.f32 %v43_v9, %v59_v10  ;;  %v61_v15 = vld [vmem:[#allocation5 + $0x28] sm:$0xff]  ;;  %90 = vst.msk [vmem:[#allocation7 + $0x8] sm:$0xff] %vm88_vm0, %v73_v7  ;;  %v76_v16 = vsub.f32 %v44_v11, %v60_v13  ;;  %v46_v18 = vld [vmem:[#allocation2 + $0x30] sm:$0xff] }
  0x2b   :  { %91 = vst.msk [vmem:[#allocation7 + $0x10] sm:$0xff] %vm88_vm0, %v74_v8  ;;  %v77_v17 = vsub.f32 %v45_v14, %v61_v15  ;;  %v62_v19 = vld [vmem:[#allocation5 + $0x30] sm:$0xff]  ;;  %v47_v20 = vld [vmem:[#allocation2 + $0x38] sm:$0xff]  ;;  %v48_v23 = vld [vmem:[#allocation2 + $0x40] sm:$0xff]  ;;  %p179_p5 = por %p178_p4, %p177_p3 }
  0x2c   :  { %92 = vst.msk [vmem:[#allocation7 + $0x18] sm:$0xff] %vm88_vm0, %v75_v12  ;;  %v78_v21 = vsub.f32 %v46_v18, %v62_v19  ;;  %v63_v22 = vld [vmem:[#allocation5 + $0x38] sm:$0xff]  ;;  %v64_v24 = vld [vmem:[#allocation5 + $0x40] sm:$0xff]  ;;  %93 = vst.msk [vmem:[#allocation7 + $0x20] sm:$0xff] %vm88_vm0, %v76_v16 }
  0x2d   :  { %94 = vst.msk [vmem:[#allocation7 + $0x28] sm:$0xff] %vm88_vm0, %v77_v17  ;;  %v79_v25 = vsub.f32 %v47_v20, %v63_v22  ;;  %v80_v26 = vsub.f32 %v48_v23, %v64_v24  ;;  %v49_v27 = vld [vmem:[#allocation2 + $0x48] sm:$0xff]  ;;  %v50_v29 = vld [vmem:[#allocation2 + $0x50] sm:$0xff]  ;;  %v51_v32 = vld [vmem:[#allocation2 + $0x58] sm:$0xff]  ;;  %p180_p6 = pnand %p179_p5, %p173_p2 }
  0x2e   :  { %v65_v28 = vld [vmem:[#allocation5 + $0x48] sm:$0xff]  ;;  %95 = vst.msk [vmem:[#allocation7 + $0x30] sm:$0xff] %vm88_vm0, %v78_v21  ;;  %v66_v31 = vld [vmem:[#allocation5 + $0x50] sm:$0xff]  ;;  %v67_v33 = vld [vmem:[#allocation5 + $0x58] sm:$0xff] }
  0x2f   :  { %v81_v30 = vsub.f32 %v49_v27, %v65_v28  ;;  %96 = vst.msk [vmem:[#allocation7 + $0x38] sm:$0xff] %vm88_vm0, %v79_v25  ;;  %97 = vst.msk [vmem:[#allocation7 + $0x40] sm:$0xff] %vm88_vm0, %v80_v26  ;;  %v82_v34 = vsub.f32 %v50_v29, %v66_v31  ;;  %v83_v35 = vsub.f32 %v51_v32, %v67_v33  ;;  %v52_v36 = vld [vmem:[#allocation2 + $0x60] sm:$0xff]  ;;  %v53_v38 = vld [vmem:[#allocation2 + $0x68] sm:$0xff] }
  0x30   :  { %v68_v37 = vld [vmem:[#allocation5 + $0x60] sm:$0xff]  ;;  %v69_v40 = vld [vmem:[#allocation5 + $0x68] sm:$0xff]  ;;  %v54_v41 = vld [vmem:[#allocation2 + $0x70] sm:$0xff] }
  0x31   :  { %98 = vst.msk [vmem:[#allocation7 + $0x48] sm:$0xff] %vm88_vm0, %v81_v30  ;;  %v84_v39 = vsub.f32 %v52_v36, %v68_v37  ;;  %v70_v42 = vld [vmem:[#allocation5 + $0x70] sm:$0xff]  ;;  %99 = vst.msk [vmem:[#allocation7 + $0x50] sm:$0xff] %vm88_vm0, %v82_v34  ;;  %v85_v43 = vsub.f32 %v53_v38, %v69_v40  ;;  %v55_v45 = vld [vmem:[#allocation2 + $0x78] sm:$0xff] }
  0x32   :  { %100 = vst.msk [vmem:[#allocation7 + $0x58] sm:$0xff] %vm88_vm0, %v83_v35  ;;  %v86_v44 = vsub.f32 %v54_v41, %v70_v42  ;;  %v71_v46 = vld [vmem:[#allocation5 + $0x78] sm:$0xff] }
  0x33   :  { %101 = vst.msk [vmem:[#allocation7 + $0x60] sm:$0xff] %vm88_vm0, %v84_v39  ;;  %v87_v47 = vsub.f32 %v55_v45, %v71_v46  ;;  %102 = vst.msk [vmem:[#allocation7 + $0x68] sm:$0xff] %vm88_vm0, %v85_v43 }
  0x34   :  { %103 = vst.msk [vmem:[#allocation7 + $0x70] sm:$0xff] %vm88_vm0, %v86_v44 }
  0x35   :  { %104 = vst.msk [vmem:[#allocation7 + $0x78] sm:$0xff] %vm88_vm0, %v87_v47 }
  0x36   :  { %183 = shalt.err (!%p180_p6)
}
  0x37   :  { %s184_s10 = scalar_lea.hbm %s283_s2, 2048 }
  0x38   :  { %p185_p7 = scmp.ne.s32.totalorder %s283_s2, %s184_s10  ;;  %p188_p8 = scmp.lt.u32.totalorder %s184_s10, %s283_s2 }
  0x3a   :  { %p190_p9 = pnand %p188_p8, %p185_p7 }
  0x3c   :  { %193 = shalt.err (!%p190_p9)
}
  0x3d   :  { %116 = dma.vmem_to_hbm [thread:$0]  %s111_s6, 2048, %s283_s2, [#allocation4], %s201_s19, %s201_s19, %s202_s20  }
  0x3e   :  { %198 = dma.done.wait [#allocation4], 2048  }
  0x3f   :  { %199 = vsyncadd [#allocation4], 4294965248 }
  0x40   :  { %120 = vsyncpa [#allocation3], 1 }
  0x41   :  { %121 = vsyncpa [#allocation6], 1 }
  0x42   :  { %122 = vsyncpa [#allocation4], 1 }

</bundles_post_ra>
